<compile_context>
chip_gen: v7x
topology: tpu7x:2x2x1
jax: 0.10.0
libtpu: 0.0.40
codegen_flags: <defaults>
</compile_context>

<pallas_src>
import functools
import math

import jax
import jax.numpy as jnp
import numpy as np
from jax.experimental import pallas as pl
from jax.experimental.pallas import tpu as pltpu

# ---------------- hyperparameters (small, forward-consistent) ----------------
N_GRAPHS = 4         # batch of graphs processed in one pallas_call
N_NODES = 8          # nodes per graph (dim_size)
N_EDGES = 16         # edges per graph
HIDDEN = 32          # hidden_channels
NUM_GAUSSIANS = 16   # num_gaussians
NUM_FILTERS = 32     # num_filters
CUTOFF = 10.0        # cutoff
LANES = 128          # TPU lane width; all feature dims padded to this

GRID_STEPS = 2                    # 2 blocks: shards across both TCs on v7x
GPB = N_GRAPHS // GRID_STEPS      # graphs per block
NB = GPB * N_NODES                # nodes per block (16)
EB = GPB * N_EDGES                # edges per block (32)

# lane layout inside the packed buffers
EW_LANE = NUM_GAUSSIANS           # edge buffer: lane holding edge_weight
GM_LANE = 32                      # edge buffer: lanes [GM_LANE, GM_LANE+NB) = gather one-hot
SM_LANE = 64                      # node buffer: lanes [SM_LANE, SM_LANE+EB) = scatter one-hot

assert N_GRAPHS % GRID_STEPS == 0
assert GM_LANE >= NUM_GAUSSIANS + 1 and GM_LANE + NB <= LANES
assert SM_LANE >= HIDDEN and SM_LANE + EB <= LANES


# ------------------------------- Pallas kernel -------------------------------
def interaction_kernel(x_ref, ef_ref, w_ref, out_ref, *,
                       ew_lane, gm_lane, sm_lane, nb, eb, cutoff):
    """One block (= GPB graphs) per grid step.

    x_ref  : (NB, P) f32  lanes [0,H)=node feats, [SM_LANE,SM_LANE+EB)=scatter one-hot
    ef_ref : (EB, P) f32  lanes [0,G)=edge_attr, G=edge_weight, [GM_LANE,GM_LANE+NB)=gather one-hot
    w_ref  : (6, P, P) f32 packed [wm1.T, wm2.T, wl1.T, wl2.T, wlin.T, biases-as-rows]
    out_ref: (NB, P) f32  lanes >= HIDDEN come out zero
    """
    f32 = jnp.float32
    xall = x_ref[...]            # (NB, P)
    ef = ef_ref[...]             # (EB, P)
    bias = w_ref[5]              # (P, P): rows 0..3 hold bm1, bm2, bl2, blin

    # ---- filter network: Linear -> SiLU -> Linear
    #      (edge_weight / one-hot lanes hit zero rows of wm1 -> no leak)
    h = jnp.dot(ef, w_ref[0], preferred_element_type=f32) + bias[0:1, :]
    h = h * jax.nn.sigmoid(h)                                               # SiLU
    W = jnp.dot(h, w_ref[1], preferred_element_type=f32) + bias[1:2, :]     # (EB, P)

    # ---- cosine cutoff  C = 0.5 * (cos(edge_weight * pi / cutoff) + 1)
    ew = ef[:, ew_lane:ew_lane + 1]                                         # (EB, 1)
    C = 0.5 * (jnp.cos(ew * (math.pi / cutoff)) + 1.0)
    W = W * C                                                               # broadcast over P

    # ---- CFConv.lin1 (no bias): project node features to filter space
    #      (scatter one-hot lanes hit zero rows of wl1 -> no leak)
    x1 = jnp.dot(xall, w_ref[2], preferred_element_type=f32)                # (NB, P)

    # ---- gather x_j = x1[src] via packed block-diagonal one-hot (EB, NB)
    gmat = ef[:, gm_lane:gm_lane + nb]
    x_j = jnp.dot(gmat, x1, preferred_element_type=f32) * W                 # (EB, P)

    # ---- scatter-add onto dst via packed block-diagonal one-hot (NB, EB)
    smat = xall[:, sm_lane:sm_lane + eb]
    agg = jnp.dot(smat, x_j, preferred_element_type=f32)                    # (NB, P)

    # ---- CFConv.lin2 -> SiLU -> final lin
    y = jnp.dot(agg, w_ref[3], preferred_element_type=f32) + bias[2:3, :]
    y = y * jax.nn.sigmoid(y)                                               # act = SiLU
    out_ref[...] = jnp.dot(y, w_ref[4], preferred_element_type=f32) + bias[3:4, :]


# --------------------------------- wrapper ------------------------------------
@jax.jit
def interaction_block(x, src, dst, edge_weight, edge_attr, params):
    """x: (B,N,H); src/dst/edge_weight: (B,E); edge_attr: (B,E,G)."""
    B, N, H = x.shape
    E, G = edge_attr.shape[1], edge_attr.shape[2]
    F = params["wm1"].shape[0]
    P = LANES
    GS, nb, eb = GRID_STEPS, NB, EB
    TN, TE = B * N, B * E
    f32 = jnp.float32

    # ---- block-local indices: offset each graph by its slot within the block
    local_off = (jnp.arange(B, dtype=jnp.int32) % GPB)[:, None] * N
    src_loc = (src.astype(jnp.int32) + local_off).reshape(GS, eb)
    dst_loc = (dst.astype(jnp.int32) + local_off).reshape(GS, eb)

    # ---- block-diagonal one-hot gather / scatter matrices (exact 0/1 in f32)
    node_iota = jnp.arange(nb, dtype=jnp.int32)
    gmat = (src_loc[:, :, None] == node_iota[None, None, :]).astype(f32)   # (GS, EB, NB)
    smat = (dst_loc[:, None, :] == node_iota[None, :, None]).astype(f32)   # (GS, NB, EB)

    # ---- node buffer: features + packed scatter one-hot
    x_pack = jnp.zeros((TN, P), f32)
    x_pack = x_pack.at[:, :H].set(x.reshape(TN, H).astype(f32))
    x_pack = x_pack.at[:, SM_LANE:SM_LANE + eb].set(smat.reshape(TN, eb))

    # ---- edge buffer: edge_attr + edge_weight + packed gather one-hot
    ef_pack = jnp.zeros((TE, P), f32)
    ef_pack = ef_pack.at[:, :G].set(edge_attr.reshape(TE, G).astype(f32))
    ef_pack = ef_pack.at[:, EW_LANE].set(edge_weight.reshape(TE).astype(f32))
    ef_pack = ef_pack.at[:, GM_LANE:GM_LANE + nb].set(gmat.reshape(TE, nb))

    # ---- packed weights (transposed, zero-padded) + biases as an extra slice
    Wp = jnp.zeros((6, P, P), f32)
    Wp = Wp.at[0, :G, :F].set(params["wm1"].T)
    Wp = Wp.at[1, :F, :F].set(params["wm2"].T)
    Wp = Wp.at[2, :H, :F].set(params["wl1"].T)
    Wp = Wp.at[3, :F, :H].set(params["wl2"].T)
    Wp = Wp.at[4, :H, :H].set(params["wlin"].T)
    Wp = Wp.at[5, 0, :F].set(params["bm1"])
    Wp = Wp.at[5, 1, :F].set(params["bm2"])
    Wp = Wp.at[5, 2, :H].set(params["bl2"])
    Wp = Wp.at[5, 3, :H].set(params["blin"])

    kernel = functools.partial(
        interaction_kernel,
        ew_lane=EW_LANE, gm_lane=GM_LANE, sm_lane=SM_LANE,
        nb=nb, eb=eb, cutoff=CUTOFF)

    # advisory cost estimate (7 matmuls / step on padded shapes)
    flops = GS * (2 * P * P * (2 * eb + 3 * nb) + 4 * eb * nb * P)
    transcendentals = GS * (eb * P + nb * P + eb)
    bytes_accessed = 4 * (2 * TN * P + TE * P + 6 * P * P)

    out_pack = pl.pallas_call(
        kernel,
        out_shape=jax.ShapeDtypeStruct((TN, P), f32),
        grid=(GS,),
        in_specs=[
            pl.BlockSpec((nb, P), lambda g: (g, 0)),        # node buffer
            pl.BlockSpec((eb, P), lambda g: (g, 0)),        # edge buffer
            pl.BlockSpec((6, P, P), lambda g: (0, 0, 0)),   # weights+biases (resident)
        ],
        out_specs=pl.BlockSpec((nb, P), lambda g: (g, 0)),
        compiler_params=pltpu.CompilerParams(
            dimension_semantics=("parallel",)),
        cost_estimate=pl.CostEstimate(
            flops=flops, transcendentals=transcendentals,
            bytes_accessed=bytes_accessed),
    )(x_pack, ef_pack, Wp)

    return out_pack[:, :H].reshape(B, N, H)


# ------------------------------ reference (JAX) -------------------------------
def interaction_block_ref(x, src, dst, edge_weight, edge_attr, params):
    def silu(v):
        return v * jax.nn.sigmoid(v)

    h = edge_attr @ params["wm1"].T + params["bm1"]
    W = silu(h) @ params["wm2"].T + params["bm2"]
    C = 0.5 * (jnp.cos(edge_weight * math.pi / CUTOFF) + 1.0)
    W = W * C[:, None]
    x1 = x @ params["wl1"].T
    x_j = x1[src] * W
    agg = jnp.zeros((x.shape[0], NUM_FILTERS), jnp.float32).at[dst].add(x_j)
    y = silu(agg @ params["wl2"].T + params["bl2"])
    return y @ params["wlin"].T + params["blin"]


# ------------------------------- param init ----------------------------------
def xavier_uniform(key, out_dim, in_dim):
    a = math.sqrt(6.0 / (in_dim + out_dim))
    return jax.random.uniform(key, (out_dim, in_dim), jnp.float32, -a, a)


def make_params(key):
    ks = jax.random.split(key, 9)
    return {
        # mlp = Linear(G, F) -> SiLU -> Linear(F, F)
        "wm1": xavier_uniform(ks[0], NUM_FILTERS, NUM_GAUSSIANS),
        "bm1": 0.1 * jax.random.normal(ks[5], (NUM_FILTERS,), jnp.float32),
        "wm2": xavier_uniform(ks[1], NUM_FILTERS, NUM_FILTERS),
        "bm2": 0.1 * jax.random.normal(ks[6], (NUM_FILTERS,), jnp.float32),
        # CFConv lin1 (no bias), lin2
        "wl1": xavier_uniform(ks[2], NUM_FILTERS, HIDDEN),
        "wl2": xavier_uniform(ks[3], HIDDEN, NUM_FILTERS),
        "bl2": 0.1 * jax.random.normal(ks[7], (HIDDEN,), jnp.float32),
        # final lin
        "wlin": xavier_uniform(ks[4], HIDDEN, HIDDEN),
        "blin": 0.1 * jax.random.normal(ks[8], (HIDDEN,), jnp.float32),
    }


if __name__ == "__main__":
    key = jax.random.PRNGKey(0)
    k_x, k_src, k_dst, k_ew, k_ea, k_p = jax.random.split(key, 6)

    B = N_GRAPHS
    x = jax.random.normal(k_x, (B, N_NODES, HIDDEN), jnp.float32)
    src = jax.random.randint(k_src, (B, N_EDGES), 0, N_NODES, jnp.int32)
    dst = jax.random.randint(k_dst, (B, N_EDGES), 0, N_NODES, jnp.int32)
    edge_weight = jax.random.uniform(k_ew, (B, N_EDGES), jnp.float32, 0.0, CUTOFF)
    edge_attr = jax.random.normal(k_ea, (B, N_EDGES, NUM_GAUSSIANS), jnp.float32)
    params = make_params(k_p)

    out = interaction_block(x, src, dst, edge_weight, edge_attr, params)
    out = jax.block_until_ready(out)

    ref = jnp.stack([
        interaction_block_ref(x[b], src[b], dst[b], edge_weight[b], edge_attr[b], params)
        for b in range(B)
    ])
    np.testing.assert_allclose(np.asarray(out), np.asarray(ref), rtol=1e-4, atol=1e-5)

    print("KERNEL_OK")
</pallas_src>

<mosaic_0001>
module attributes {stable_mosaic.version = 11 : i64} {
  func.func @interaction_kernel(%arg0: i32, %arg1: memref<16x128xf32, #tpu.memory_space<vmem>>, %arg2: memref<32x128xf32, #tpu.memory_space<vmem>>, %arg3: memref<6x128x128xf32, #tpu.memory_space<vmem>>, %arg4: memref<16x128xf32, #tpu.memory_space<vmem>>) attributes {dimension_semantics = [#tpu.dimension_semantics<parallel>], iteration_bounds = array<i64: 2>, scalar_prefetch = 0 : i64, scratch_operands = 0 : i64, tpu.core_type = #tpu.core_type<tc>, window_params = [{transform_indices = @transform_0, window_bounds = array<i64: 16, 128>}, {transform_indices = @transform_1, window_bounds = array<i64: 32, 128>}, {pipeline_mode = #tpu.pipeline_mode<synchronous>, transform_indices = @transform_2, window_bounds = array<i64: 6, 128, 128>}, {transform_indices = @transform_3, window_bounds = array<i64: 16, 128>}]} {
    %c0 = arith.constant 0 : index
    %c0_0 = arith.constant 0 : index
    %0 = vector.load %arg1[%c0, %c0_0] : memref<16x128xf32, #tpu.memory_space<vmem>>, vector<16x128xf32>
    %c0_1 = arith.constant 0 : index
    %c0_2 = arith.constant 0 : index
    %1 = vector.load %arg2[%c0_1, %c0_2] : memref<32x128xf32, #tpu.memory_space<vmem>>, vector<32x128xf32>
    %c5 = arith.constant 5 : index
    %c0_3 = arith.constant 0 : index
    %c0_4 = arith.constant 0 : index
    %2 = vector.load %arg3[%c5, %c0_3, %c0_4] : memref<6x128x128xf32, #tpu.memory_space<vmem>>, vector<1x128x128xf32>
    %3 = vector.shape_cast %2 : vector<1x128x128xf32> to vector<128x128xf32>
    %c0_5 = arith.constant 0 : index
    %c0_6 = arith.constant 0 : index
    %c0_7 = arith.constant 0 : index
    %4 = vector.load %arg3[%c0_5, %c0_6, %c0_7] : memref<6x128x128xf32, #tpu.memory_space<vmem>>, vector<1x128x128xf32>
    %5 = vector.shape_cast %4 : vector<1x128x128xf32> to vector<128x128xf32>
    %cst = arith.constant dense<0.000000e+00> : vector<32x128xf32>
    %6 = tpu.matmul %1, %5, %cst {dimension_numbers = #tpu.dot_dimension_numbers<[1], [0], [0], [1], [0, 0, 1, 1], [], []>} : vector<32x128xf32>, vector<128x128xf32>, vector<32x128xf32> -> vector<32x128xf32>
    %7 = vector.extract_strided_slice %3 {offsets = [0, 0], sizes = [1, 128], strides = [1, 1]} : vector<128x128xf32> to vector<1x128xf32>
    %8 = vector.broadcast %7 : vector<1x128xf32> to vector<32x128xf32>
    %9 = arith.addf %6, %8 : vector<32x128xf32>
    %10 = arith.negf %9 : vector<32x128xf32>
    %11 = math.exp %10 : vector<32x128xf32>
    %cst_8 = arith.constant 1.000000e+00 : f32
    %12 = vector.broadcast %cst_8 : f32 to vector<32x128xf32>
    %13 = arith.addf %12, %11 : vector<32x128xf32>
    %14 = arith.divf %12, %13 : vector<32x128xf32>
    %15 = arith.mulf %9, %14 : vector<32x128xf32>
    %c1 = arith.constant 1 : index
    %c0_9 = arith.constant 0 : index
    %c0_10 = arith.constant 0 : index
    %16 = vector.load %arg3[%c1, %c0_9, %c0_10] : memref<6x128x128xf32, #tpu.memory_space<vmem>>, vector<1x128x128xf32>
    %17 = vector.shape_cast %16 : vector<1x128x128xf32> to vector<128x128xf32>
    %cst_11 = arith.constant dense<0.000000e+00> : vector<32x128xf32>
    %18 = tpu.matmul %15, %17, %cst_11 {dimension_numbers = #tpu.dot_dimension_numbers<[1], [0], [0], [1], [0, 0, 1, 1], [], []>} : vector<32x128xf32>, vector<128x128xf32>, vector<32x128xf32> -> vector<32x128xf32>
    %19 = vector.extract_strided_slice %3 {offsets = [1, 0], sizes = [1, 128], strides = [1, 1]} : vector<128x128xf32> to vector<1x128xf32>
    %20 = vector.broadcast %19 : vector<1x128xf32> to vector<32x128xf32>
    %21 = arith.addf %18, %20 : vector<32x128xf32>
    %22 = vector.extract_strided_slice %1 {offsets = [0, 16], sizes = [32, 1], strides = [1, 1]} : vector<32x128xf32> to vector<32x1xf32>
    %cst_12 = arith.constant 0.314159274 : f32
    %23 = vector.broadcast %cst_12 : f32 to vector<32x1xf32>
    %24 = arith.mulf %22, %23 : vector<32x1xf32>
    %25 = math.cos %24 : vector<32x1xf32>
    %cst_13 = arith.constant 1.000000e+00 : f32
    %26 = vector.broadcast %cst_13 : f32 to vector<32x1xf32>
    %27 = arith.addf %25, %26 : vector<32x1xf32>
    %cst_14 = arith.constant 5.000000e-01 : f32
    %28 = vector.broadcast %cst_14 : f32 to vector<32x1xf32>
    %29 = arith.mulf %28, %27 : vector<32x1xf32>
    %30 = vector.broadcast %29 : vector<32x1xf32> to vector<32x128xf32>
    %31 = arith.mulf %21, %30 : vector<32x128xf32>
    %c2 = arith.constant 2 : index
    %c0_15 = arith.constant 0 : index
    %c0_16 = arith.constant 0 : index
    %32 = vector.load %arg3[%c2, %c0_15, %c0_16] : memref<6x128x128xf32, #tpu.memory_space<vmem>>, vector<1x128x128xf32>
    %33 = vector.shape_cast %32 : vector<1x128x128xf32> to vector<128x128xf32>
    %cst_17 = arith.constant dense<0.000000e+00> : vector<16x128xf32>
    %34 = tpu.matmul %0, %33, %cst_17 {dimension_numbers = #tpu.dot_dimension_numbers<[1], [0], [0], [1], [0, 0, 1, 1], [], []>} : vector<16x128xf32>, vector<128x128xf32>, vector<16x128xf32> -> vector<16x128xf32>
    %35 = vector.extract_strided_slice %1 {offsets = [0, 32], sizes = [32, 16], strides = [1, 1]} : vector<32x128xf32> to vector<32x16xf32>
    %cst_18 = arith.constant dense<0.000000e+00> : vector<32x128xf32>
    %36 = tpu.matmul %35, %34, %cst_18 {dimension_numbers = #tpu.dot_dimension_numbers<[1], [0], [0], [1], [0, 0, 1, 1], [], []>} : vector<32x16xf32>, vector<16x128xf32>, vector<32x128xf32> -> vector<32x128xf32>
    %37 = arith.mulf %36, %31 : vector<32x128xf32>
    %38 = vector.extract_strided_slice %0 {offsets = [0, 64], sizes = [16, 32], strides = [1, 1]} : vector<16x128xf32> to vector<16x32xf32>
    %cst_19 = arith.constant dense<0.000000e+00> : vector<16x128xf32>
    %39 = tpu.matmul %38, %37, %cst_19 {dimension_numbers = #tpu.dot_dimension_numbers<[1], [0], [0], [1], [0, 0, 1, 1], [], []>} : vector<16x32xf32>, vector<32x128xf32>, vector<16x128xf32> -> vector<16x128xf32>
    %c3 = arith.constant 3 : index
    %c0_20 = arith.constant 0 : index
    %c0_21 = arith.constant 0 : index
    %40 = vector.load %arg3[%c3, %c0_20, %c0_21] : memref<6x128x128xf32, #tpu.memory_space<vmem>>, vector<1x128x128xf32>
    %41 = vector.shape_cast %40 : vector<1x128x128xf32> to vector<128x128xf32>
    %cst_22 = arith.constant dense<0.000000e+00> : vector<16x128xf32>
    %42 = tpu.matmul %39, %41, %cst_22 {dimension_numbers = #tpu.dot_dimension_numbers<[1], [0], [0], [1], [0, 0, 1, 1], [], []>} : vector<16x128xf32>, vector<128x128xf32>, vector<16x128xf32> -> vector<16x128xf32>
    %43 = vector.extract_strided_slice %3 {offsets = [2, 0], sizes = [1, 128], strides = [1, 1]} : vector<128x128xf32> to vector<1x128xf32>
    %44 = vector.broadcast %43 : vector<1x128xf32> to vector<16x128xf32>
    %45 = arith.addf %42, %44 : vector<16x128xf32>
    %46 = arith.negf %45 : vector<16x128xf32>
    %47 = math.exp %46 : vector<16x128xf32>
    %cst_23 = arith.constant 1.000000e+00 : f32
    %48 = vector.broadcast %cst_23 : f32 to vector<16x128xf32>
    %49 = arith.addf %48, %47 : vector<16x128xf32>
    %50 = arith.divf %48, %49 : vector<16x128xf32>
    %51 = arith.mulf %45, %50 : vector<16x128xf32>
    %c4 = arith.constant 4 : index
    %c0_24 = arith.constant 0 : index
    %c0_25 = arith.constant 0 : index
    %52 = vector.load %arg3[%c4, %c0_24, %c0_25] : memref<6x128x128xf32, #tpu.memory_space<vmem>>, vector<1x128x128xf32>
    %53 = vector.shape_cast %52 : vector<1x128x128xf32> to vector<128x128xf32>
    %cst_26 = arith.constant dense<0.000000e+00> : vector<16x128xf32>
    %54 = tpu.matmul %51, %53, %cst_26 {dimension_numbers = #tpu.dot_dimension_numbers<[1], [0], [0], [1], [0, 0, 1, 1], [], []>} : vector<16x128xf32>, vector<128x128xf32>, vector<16x128xf32> -> vector<16x128xf32>
    %55 = vector.extract_strided_slice %3 {offsets = [3, 0], sizes = [1, 128], strides = [1, 1]} : vector<128x128xf32> to vector<1x128xf32>
    %56 = vector.broadcast %55 : vector<1x128xf32> to vector<16x128xf32>
    %57 = arith.addf %54, %56 : vector<16x128xf32>
    %c0_27 = arith.constant 0 : index
    %c0_28 = arith.constant 0 : index
    %58 = vector.load %arg4[%c0_27, %c0_28] : memref<16x128xf32, #tpu.memory_space<vmem>>, vector<16x128xf32>
    tpu.vector_store %arg4[%c0_27, %c0_28], %57 {strides = array<i32>} : memref<16x128xf32, #tpu.memory_space<vmem>>, vector<16x128xf32>,
    return
  }
  func.func @transform_0(%arg0: i32) -> (i32, i32) {
    %c0_i32 = arith.constant 0 : i32
    %c0_i32_0 = arith.constant 0 : i32
    return %arg0, %c0_i32 : i32, i32
  }
  func.func @transform_1(%arg0: i32) -> (i32, i32) {
    %c0_i32 = arith.constant 0 : i32
    %c0_i32_0 = arith.constant 0 : i32
    return %arg0, %c0_i32 : i32, i32
  }
  func.func @transform_2(%arg0: i32) -> (i32, i32, i32) {
    %c0_i32 = arith.constant 0 : i32
    %c0_i32_0 = arith.constant 0 : i32
    %c0_i32_1 = arith.constant 0 : i32
    %c0_i32_2 = arith.constant 0 : i32
    return %c0_i32, %c0_i32_0, %c0_i32_1 : i32, i32, i32
  }
  func.func @transform_3(%arg0: i32) -> (i32, i32) {
    %c0_i32 = arith.constant 0 : i32
    %c0_i32_0 = arith.constant 0 : i32
    return %arg0, %c0_i32 : i32, i32
  }
}

</mosaic_0001>

<bundles_post_ra>
// kernel: eq.24
= control target key start
LH: loop header
LB: loop body
LE: loop exit
PB: predicated region body
PF: predicated region fallthrough
CT: control target
= control target key end

     0   :  { %s6_s8 = smov 3  ;;  %vm8_vm0 = vcmask 130048   ;;  %s24_s9 = smov 16   ;;  %vm15_vm1 = vcmask 261248   ;;  %s41_s0 = inlined_call_operand.vmem [shape: s32[4,16], index: 0, kind: input, shape index: {}]   ;;  %s42_s1 = inlined_call_operand.vmem [shape: s32[2,32], index: 1, kind: output, shape index: {}]  }
   0x1   :  { %v4_v0 = vld [vmem:[%s41_s0] sm:$0xf]  ;;  %s11_s0 = smov 3 }
   0x2   :  { %5 = vst [vmem:[#allocation1] sm:$0xf] %v4_v0 }
   0x9   :  { %v12_v1 = vld [vmem:[#allocation1 + $0x1] ss:$2 sm:%s11_s0]   ;;  %v7_v2 = vld [vmem:[#allocation1] ss:$2 sm:%s6_s8]  }
   0xa   :  { %13 = vrot.lane.b32.xlu0 %v12_v1, %s24_s9  ;;  %9 = vst.msk [vmem:[#allocation0] sm:$0x3] %vm8_vm0, %v7_v2  }
  0x7c   :  { %v14_v3 = vpop.permute.xlu0 %13  }
  0x7d   :  { %16 = vst.msk [vmem:[#allocation0] sm:$0x3] %vm15_vm1, %v14_v3  }
  0x84   :  { %v20_v4 = vld [vmem:[#allocation0] sm:$0x3] }
  0x85   :  { %22 = vst [vmem:[%s42_s1] sm:$0x3] %v20_v4 }

// kernel: interaction_block.1
= control target key start
LH: loop header
LB: loop body
LE: loop exit
PB: predicated region body
PF: predicated region fallthrough
CT: control target
= control target key end

     0   :  { %s2154_s12 = smov 0   ;;  %s2864_s0 = inlined_call_operand.vmem [shape: f32[32,128], index: 0, kind: input, shape index: {}]   ;;  %s2865_s1 = inlined_call_operand.vmem [shape: f32[64,128], index: 1, kind: input, shape index: {}]   ;;  %s2866_s2 = inlined_call_operand.vmem [shape: f32[6,128,128], index: 2, kind: input, shape index: {}]   ;;  %s2867_s3 = inlined_call_operand.vmem [shape: f32[32,128], index: 3, kind: output, shape index: {}]  }
   0x1 LB: > { %s1455_s13 = sadd.s32 4294967295, %s2123_s12   ;;  %p1459_p0 = scmp.ge.s32.totalorder %s2123_s12, 1  ;;  %s2123_s12 = sphi %s2154_s12, %s13_s12  }
   0x2   : > { %p149_p1 = scmp.lt.s32.totalorder %s2123_s12, 3 }
   0x4   : > { %p150_p2 = pnand %p1459_p0, %p149_p1 }
   0x5   : > { %v204_v0 = vld [vmem:[%s2866_s2] sm:$0xff] (!%p150_p2)  ;;  %v205_v1 = vld [vmem:[%s2866_s2 + $0x8] sm:$0xff] (!%p150_p2)  ;;  %v206_v2 = vld [vmem:[%s2866_s2 + $0x10] sm:$0xff] (!%p150_p2)  ;;  %s1462_s20 = sshll.u32 (!%p150_p2), %s1455_s13, 2  ;;  %s2125_s8 = smov (!%p150_p2), 96  }
   0x6   : > { %153 = sbr.rel (%p150_p2) target bundleno = 1192 (0x4a8), region = 32  ;;  %v1869_v3 = vpack.c.bf16 (!%p150_p2), %v205_v1, %v204_v0  ;;  %v207_v4 = vld [vmem:[%s2866_s2 + $0x18] sm:$0xff] (!%p150_p2)  ;;  %p185_p3 = scmp.lt.s32.totalorder (!%p150_p2), %s1462_s20, 7  ;;  %v208_v6 = vld [vmem:[%s2866_s2 + $0x20] sm:$0xff] (!%p150_p2)  ;;  %v209_v7 = vld [vmem:[%s2866_s2 + $0x28] sm:$0xff] (!%p150_p2) }
   0x7   : > { %v1873_v5 = vpack.c.bf16 (!%p150_p2), %v207_v4, %v206_v2  ;;  %v1877_v8 = vpack.c.bf16 (!%p150_p2), %v209_v7, %v208_v6  ;;  %v210_v9 = vld [vmem:[%s2866_s2 + $0x30] sm:$0xff] (!%p150_p2)  ;;  %v211_v10 = vld [vmem:[%s2866_s2 + $0x38] sm:$0xff] (!%p150_p2)  ;;  %v212_v14 = vld [vmem:[%s2866_s2 + $0x40] sm:$0xff] (!%p150_p2)  ;;  %s1460_s23 = sshll.u32 (!%p150_p2), %s1455_s13, 1 }
   0x8   : > { %1870 = vmatprep.subr.bf16.mxu0 (!%p150_p2), %v1869_v3  ;;  %v1881_v12 = vpack.c.bf16 (!%p150_p2), %v211_v10, %v210_v9  ;;  %v213_v15 = vld [vmem:[%s2866_s2 + $0x48] sm:$0xff] (!%p150_p2)  ;;  %v214_v19 = vld [vmem:[%s2866_s2 + $0x50] sm:$0xff] (!%p150_p2)  ;;  %v215_v20 = vld [vmem:[%s2866_s2 + $0x58] sm:$0xff] (!%p150_p2)  ;;  %p179_p4 = scmp.lt.s32.totalorder (!%p150_p2), %s1460_s23, 3 }
   0x9   : > { %1872 = vmatpush3.bf16.msra.mxu0 (!%p150_p2), %v1869_v3  ;;  %v1885_v17 = vpack.c.bf16 (!%p150_p2), %v213_v15, %v212_v14  ;;  %v1889_v21 = vpack.c.bf16 (!%p150_p2), %v215_v20, %v214_v19  ;;  %v216_v22 = vld [vmem:[%s2866_s2 + $0x60] sm:$0xff] (!%p150_p2)  ;;  %v217_v23 = vld [vmem:[%s2866_s2 + $0x68] sm:$0xff] (!%p150_p2)  ;;  %v218_v25 = vld [vmem:[%s2866_s2 + $0x70] sm:$0xff] (!%p150_p2) }
   0xa   : > { %1874 = vmatprep.subr.bf16.mxu0 (!%p150_p2), %v1873_v5  ;;  %v1893_v24 = vpack.c.bf16 (!%p150_p2), %v217_v23, %v216_v22  ;;  %v219_v26 = vld [vmem:[%s2866_s2 + $0x78] sm:$0xff] (!%p150_p2)  ;;  %v1503_v28 = vld [vmem:[%s2866_s2 + $0x100] sm:$0xff] (!%p150_p2)  ;;  %v1504_v29 = vld [vmem:[%s2866_s2 + $0x108] sm:$0xff] (!%p150_p2) }
   0xb   : > { %v1897_v27 = vpack.c.bf16 (!%p150_p2), %v219_v26, %v218_v25  ;;  %v1933_v30 = vpack.c.bf16 (!%p150_p2), %v1504_v29, %v1503_v28  ;;  %v1505_v31 = vld [vmem:[%s2866_s2 + $0x110] sm:$0xff] (!%p150_p2)  ;;  %v1506_v32 = vld [vmem:[%s2866_s2 + $0x118] sm:$0xff] (!%p150_p2)  ;;  %v1507_v34 = vld [vmem:[%s2866_s2 + $0x120] sm:$0xff] (!%p150_p2) }
   0xc   : > { %v1937_v33 = vpack.c.bf16 (!%p150_p2), %v1506_v32, %v1505_v31  ;;  %v1508_v35 = vld [vmem:[%s2866_s2 + $0x128] sm:$0xff] (!%p150_p2)  ;;  %v1509_v38 = vld [vmem:[%s2866_s2 + $0x130] sm:$0xff] (!%p150_p2)  ;;  %v1510_v39 = vld [vmem:[%s2866_s2 + $0x138] sm:$0xff] (!%p150_p2) }
   0xd   : > { %s2877_s20 = smov (!%p185_p3, %s1462_s20), 7  ;;  %1876 = vmatpush3.bf16.msra.mxu0 %v1873_v5  ;;  %s2879_s23 = smov (!%p179_p4, %s1460_s23), 3  ;;  %v1941_v36 = vpack.c.bf16 %v1508_v35, %v1507_v34  ;;  %v1945_v40 = vpack.c.bf16 %v1510_v39, %v1509_v38  ;;  %v1511_v41 = vld [vmem:[%s2866_s2 + $0x140] sm:$0xff]  ;;  %v1512_v42 = vld [vmem:[%s2866_s2 + $0x148] sm:$0xff]  ;;  %v1513_v44 = vld [vmem:[%s2866_s2 + $0x150] sm:$0xff] }
   0xe   : > { %s1463_s27 = sshll.u32 %s2877_s20, 3  ;;  %1878 = vmatprep.subr.bf16.mxu0 %v1877_v8  ;;  %v1949_v43 = vpack.c.bf16 %v1512_v42, %v1511_v41  ;;  %v1514_v45 = vld [vmem:[%s2866_s2 + $0x158] sm:$0xff]  ;;  %v1515_v47 = vld [vmem:[%s2866_s2 + $0x160] sm:$0xff]  ;;  %v1516_v48 = vld [vmem:[%s2866_s2 + $0x168] sm:$0xff]  ;;  %v2126_v39 = vmov 2102212464  }
   0xf   : > { %s188_s7 = scalar_lea.vmem %s2865_s1, %s1463_s27  ;;  %v1953_v46 = vpack.c.bf16 %v1514_v45, %v1513_v44  ;;  %v1957_v49 = vpack.c.bf16 %v1516_v48, %v1515_v47  ;;  %v1517_v50 = vld [vmem:[%s2866_s2 + $0x170] sm:$0xff]  ;;  %v1518_v51 = vld [vmem:[%s2866_s2 + $0x178] sm:$0xff]  ;;  %v1471_v54 = vld [vmem:[%s2866_s2 + $0x80] sm:$0xff]  ;;  %v2127_v41 = vmov 920167782   ;;  %s2133_s27 = smov 64  }
  0x10   : > { %v2191_v11 = vld [vmem:[%s188_s7] sm:$0xff]  ;;  %v2194_v13 = vld [vmem:[%s188_s7 + $0x10] sm:$0xff]  ;;  %v2204_v16 = vld [vmem:[%s188_s7 + $0x8] sm:$0xff]  ;;  %v1961_v52 = vpack.c.bf16 %v1518_v51, %v1517_v50  ;;  %v2128_v45 = vmov 1326507024  }
  0x11   : > { %1699 = vmatprep.mubr.f32.mxu0 %v2191_v11  ;;  %987 = vrot.lane.b32.xlu0 %v2191_v11, %s2125_s8  ;;  %v2206_v18 = vld [vmem:[%s188_s7 + $0x18] sm:$0xff]  ;;  %v1472_v55 = vld [vmem:[%s2866_s2 + $0x88] sm:$0xff]  ;;  %v2303_v57 = vmul.f32 0.31415927, %v2191_v11  ;;  %v2306_v58 = vmul.f32 0.31415927, %v2204_v16 }
  0x12   : > { %991 = vrot.lane.b32.xlu1 %v2194_v13, %s2125_s8  ;;  %1880 = vmatpush3.bf16.msra.mxu0 %v1877_v8  ;;  %v1901_v56 = vpack.c.bf16 %v1472_v55, %v1471_v54  ;;  %v1473_v59 = vld [vmem:[%s2866_s2 + $0x90] sm:$0xff]  ;;  %v1474_v60 = vld [vmem:[%s2866_s2 + $0x98] sm:$0xff]  ;;  %v1475_v0 = vld [vmem:[%s2866_s2 + $0xa0] sm:$0xff] }
  0x13   : > { %1882 = vmatprep.subr.bf16.mxu0 %v1881_v12  ;;  %v1905_v61 = vpack.c.bf16 %v1474_v60, %v1473_v59  ;;  %v450_v62 = vand.u32 2139095040, %v2303_v57  ;;  %v553_v63 = vand.u32 2139095040, %v2306_v58  ;;  %v1476_v1 = vld [vmem:[%s2866_s2 + $0xa8] sm:$0xff]  ;;  %v1477_v5 = vld [vmem:[%s2866_s2 + $0xb0] sm:$0xff]  ;;  %v1478_v6 = vld [vmem:[%s2866_s2 + $0xb8] sm:$0xff] }
  0x14   : > { %1902 = vmatprep.subr.bf16.mxu1 %v1901_v56  ;;  %v1909_v2 = vpack.c.bf16 %v1476_v1, %v1475_v0  ;;  %v1913_v7 = vpack.c.bf16 %v1478_v6, %v1477_v5  ;;  %v1479_v10 = vld [vmem:[%s2866_s2 + $0xc0] sm:$0xff]  ;;  %v1480_v11 = vld [vmem:[%s2866_s2 + $0xc8] sm:$0xff]  ;;  %v1482_v19 = vld [vmem:[%s2866_s2 + $0xd8] sm:$0xff]  ;;  %v2130_v5 = vmov 683565275  }
  0x15   : > { %989 = vrot.lane.b32.xlu0 %v2204_v16, %s2125_s8  ;;  %1904 = vmatpush3.bf16.msra.mxu1 %v1901_v56  ;;  %v451_v3 = vshrl.u32 %v450_v62, 23  ;;  %v554_v4 = vshrl.u32 %v553_v63, 23  ;;  %v1917_v14 = vpack.c.bf16 %v1480_v11, %v1479_v10  ;;  %v1483_v22 = vld [vmem:[%s2866_s2 + $0xe0] sm:$0xff]  ;;  %v1484_v23 = vld [vmem:[%s2866_s2 + $0xe8] sm:$0xff]  ;;  %v1485_v28 = vld [vmem:[%s2866_s2 + $0xf0] sm:$0xff] }
  0x16   : > { %993 = vrot.lane.b32.xlu1 %v2206_v18, %s2125_s8  ;;  %1884 = vmatpush3.bf16.msra.mxu0 %v1881_v12  ;;  %s1461_s8 = sshll.u32 %s2879_s23, 3  ;;  %v2335_v12 = vmul.f32 0.31415927, %v2194_v13  ;;  %v1925_v26 = vpack.c.bf16 %v1484_v23, %v1483_v22  ;;  %v1486_v29 = vld [vmem:[%s2866_s2 + $0xf8] sm:$0xff]  ;;  %v2132_v11 = vmov 2131351028  }
  0x17   : > { %1886 = vmatprep.subr.bf16.mxu0 %v1885_v17  ;;  %s2256_s17 = scalar_lea.vmem %s2864_s0, %s1461_s8  ;;  %1906 = vmatprep.subr.bf16.mxu1 %v1905_v61  ;;  %v1487_v8 = vadd.s32 4294967169, %v451_v3  ;;  %v1491_v9 = vadd.s32 4294967169, %v554_v4  ;;  %v1929_v32 = vpack.c.bf16 %v1486_v29, %v1485_v28  ;;  %v2129_v3 = vmov 16   ;;  %s194_s21 = scalar_lea.vmem %s2867_s3, %s1461_s8 }
  0x18   : > { %v196_v37 = vld [vmem:[%s2256_s17] sm:$0xff]  ;;  %v2293_v53 = vld [vmem:[%s2256_s17 + $0x8] sm:$0xff]  ;;  %v656_v20 = vand.u32 2139095040, %v2335_v12  ;;  %2075 = vset.pattern.permute.xlu1 %v2129_v3  ;;  %2074 = vset.pattern.permute.xlu0 %v2129_v3  ;;  %v550_v4 = vand.u32 2147483647, %v2306_v58 }
  0x19   : > { %1908 = vmatpush3.bf16.msra.mxu1 %v1905_v61  ;;  %v457_v15 = vadd.s32 1, %v1487_v8  ;;  %v2131_v8 = vmov 2475754826   ;;  %v447_v28 = vand.u32 2147483647, %v2303_v57 }
  0x1a   : > { %1888 = vmatpush3.bf16.msra.mxu0 %v1885_v17  ;;  %1910 = vmatprep.subr.bf16.mxu1 %v1909_v2  ;;  %v1481_v17 = vld [vmem:[%s2866_s2 + $0xd0] sm:$0xff] }
  0x1b   : > { %1890 = vmatprep.subr.bf16.mxu0 %v1889_v21  ;;  %vm458_vm0 = vcmp.gt.s32.totalorder %v457_v15, 0 }
  0x1d   : > { %1912 = vmatpush3.bf16.msra.mxu1 %v1909_v2 }
  0x1e   : > { %1892 = vmatpush3.bf16.msra.mxu0 %v1889_v21  ;;  %1914 = vmatprep.subr.bf16.mxu1 %v1913_v7  ;;  %v2345_v21 = vmul.f32 0.31415927, %v2206_v18 }
  0x1f   : > { %1894 = vmatprep.subr.bf16.mxu0 %v1893_v24 }
  0x20   : > { %v759_v25 = vand.u32 2139095040, %v2345_v21 }
  0x21   : > { %1916 = vmatpush3.bf16.msra.mxu1 %v1913_v7 }
  0x22   : > { %1896 = vmatpush3.bf16.msra.mxu0 %v1893_v24  ;;  %1918 = vmatprep.subr.bf16.mxu1 %v1917_v14  ;;  %v657_v24 = vshrl.u32 %v656_v20, 23  ;;  %v760_v31 = vshrl.u32 %v759_v25, 23 }
  0x23   : > { %1898 = vmatprep.subr.bf16.mxu0 %v1897_v27 }
  0x25   : > { %1920 = vmatpush3.bf16.msra.mxu1 %v1917_v14 }
  0x26   : > { %1900 = vmatpush3.bf16.msra.mxu0 %v1897_v27  ;;  %v459_v27 = vsel %vm458_vm0, %v457_v15, 0 }
  0x27   : > { %1934 = vmatprep.subr.bf16.mxu0 %v1933_v30 }
  0x29   : > { %1700 = vmatmul.mubr.f32.vlgmr.msra.gmra.mrb[0].mxu0 %v2204_v16  ;;  %v560_v16 = vadd.s32 1, %v1491_v9 }
  0x2a   : > { %1936 = vmatpush3.bf16.msra.mxu0 %v1933_v30  ;;  %1702 = vmatprep.mubr.f32.mxu0 %v2194_v13  ;;  %v1921_v13 = vpack.c.bf16 %v1482_v19, %v1481_v17  ;;  %v1495_v30 = vadd.s32 4294967169, %v657_v24  ;;  %v557_v17 = vand.u32 8388607, %v550_v4 }
  0x2b   : > { %1938 = vmatprep.subr.bf16.mxu0 %v1937_v33  ;;  %vm561_vm1 = vcmp.gt.s32.totalorder %v560_v16, 0 }
  0x2c   : > { %1922 = vmatprep.subr.bf16.mxu1 %v1921_v13  ;;  %v663_v35 = vadd.s32 1, %v1495_v30  ;;  %v558_v23 = vor.u32 8388608, %v557_v17 }
  0x2d   : > { %1703 = vmatmul.mubr.f32.gmra.mrb[2].mxu0 %v2206_v18  ;;  %1924 = vmatpush3.bf16.msra.mxu1 %v1921_v13  ;;  %v562_v18 = vsel %vm561_vm1, %v560_v16, 0 }
  0x2e   : > { %1940 = vmatpush3.bf16.msra.mxu0 %v1937_v33  ;;  %1775 = vmatprep.mubr.f32.mxu0 %v196_v37  ;;  %v2360_v33 = vand.u32 31, %v459_v27  ;;  %v564_v34 = vand.u32 31, %v562_v18  ;;  %vm664_vm2 = vcmp.gt.s32.totalorder %v663_v35, 0  ;;  %v563_v50 = vshrl.u32 %v562_v18, 5 }
  0x2f   : > { %1942 = vmatprep.subr.bf16.mxu0 %v1941_v36  ;;  %1926 = vmatprep.subr.bf16.mxu1 %v1925_v26 }
  0x30   : > { %v2363_v37 = vsub.s32 32, %v2360_v33  ;;  %v565_v38 = vsub.s32 32, %v564_v34  ;;  %v476_v42 = vshll.u32 %v2127_v41, %v2360_v33  ;;  %v579_v47 = vshll.u32 %v2127_v41, %v564_v34 }
  0x31   : > { %1928 = vmatpush3.bf16.msra.mxu1 %v1925_v26  ;;  %v576_v51 = vshll.u32 %v2126_v39, %v564_v34  ;;  %vm585_vm5 = vcmp.lt.s32.totalorder %v563_v50, 4  ;;  %v567_v7 = vshll.u32 %v2130_v5, %v564_v34  ;;  %v570_v10 = vshll.u32 %v2131_v8, %v564_v34 }
  0x32   : > { %1944 = vmatpush3.bf16.msra.mxu0 %v1941_v36  ;;  %1930 = vmatprep.subr.bf16.mxu1 %v1929_v32  ;;  %v1499_v36 = vadd.s32 4294967169, %v760_v31  ;;  %v474_v44 = vshrl.u32 %v2127_v41, %v2363_v37  ;;  %v580_v48 = vshrl.u32 %v2128_v45, %v565_v38  ;;  %v577_v56 = vshrl.u32 %v2127_v41, %v565_v38 }
  0x33   : > { %1946 = vmatprep.subr.bf16.mxu0 %v1945_v40  ;;  %v566_v6 = vshrl.u32 %v2130_v5, %v565_v38  ;;  %v568_v9 = vshrl.u32 %v2131_v8, %v565_v38  ;;  %v571_v14 = vshrl.u32 %v2132_v11, %v565_v38  ;;  %v573_v15 = vshll.u32 %v2132_v11, %v564_v34 }
  0x34   : > { %v581_v59 = vor.u32 %v580_v48, %v579_v47  ;;  %v578_v0 = vor.u32 %v577_v56, %v576_v51  ;;  %v574_v19 = vshrl.u32 %v2126_v39, %v565_v38  ;;  %vm582_vm6 = vcmp.lt.s32.totalorder %v563_v50, 1 }
  0x35   : > { %1932 = vmatpush3.bf16.msra.mxu1 %v1929_v32  ;;  %v569_v13 = vor.u32 %v568_v9, %v567_v7  ;;  %v572_v22 = vor.u32 %v571_v14, %v570_v10  ;;  %vm584_vm7 = vcmp.lt.s32.totalorder %v563_v50, 3  ;;  %vm583_vm8 = vcmp.lt.s32.totalorder %v563_v50, 2 }
  0x36   : > { %1948 = vmatpush3.bf16.msra.mxu0 %v1945_v40  ;;  %v473_v40 = vshll.u32 %v2126_v39, %v2360_v33  ;;  %v595_v1 = vsel %vm585_vm5, %v581_v59, 1326507024  ;;  %v591_v16 = vsel %vm585_vm5, %v578_v0, 920167782  ;;  %v575_v24 = vor.u32 %v574_v19, %v573_v15 }
  0x37   : > { %1950 = vmatprep.subr.bf16.mxu0 %v1949_v43  ;;  %v596_v25 = vsel %vm584_vm7, %v578_v0, %v595_v1  ;;  %v590_v18 = vsel %vm582_vm6, %v569_v13, %v572_v22  ;;  %v598_v32 = vshll.u32 %v558_v23, 8  ;;  %v463_v50 = vshrl.u32 %v2130_v5, %v2363_v37 }
  0x38   : > { %v2380_v54 = vor.u32 %v474_v44, %v473_v40  ;;  %v587_v29 = vsel %vm585_vm5, %v575_v24, 2102212464  ;;  %v592_v30 = vsel %vm584_vm7, %v575_v24, %v591_v16  ;;  %v594_v31 = vsel %vm582_vm6, %v572_v22, %v575_v24 }
  0x39   : > { %v597_v38 = vsel %vm583_vm8, %v594_v31, %v596_v25  ;;  %v454_v44 = vand.u32 8388607, %v447_v28  ;;  %v465_v56 = vshrl.u32 %v2131_v8, %v2363_v37  ;;  %v467_v59 = vshll.u32 %v2131_v8, %v2360_v33 }
  0x3a   : > { %1952 = vmatpush3.bf16.msra.mxu0 %v1949_v43  ;;  %v766_v43 = vadd.s32 1, %v1499_v36  ;;  %v593_v36 = vsel %vm583_vm8, %v590_v18, %v592_v30  ;;  %v468_v0 = vshrl.u32 %v2132_v11, %v2363_v37  ;;  %v470_v1 = vshll.u32 %v2132_v11, %v2360_v33 }
  0x3b   : > { %1954 = vmatprep.subr.bf16.mxu0 %v1953_v46  ;;  %v2426_v47 = vmul.u32.u64.low %v598_v32, %v593_v36  ;;  %v2427_v48 = vmul.u32.u64.high %v598_v32, %v593_v36, %v2426_v47  ;;  %v455_v51 = vor.u32 8388608, %v454_v44  ;;  %v471_v3 = vshrl.u32 %v2126_v39, %v2363_v37 }
  0x3c   : > { %vm767_vm3 = vcmp.gt.s32.totalorder %v766_v43, 0  ;;  %v469_v9 = vor.u32 %v468_v0, %v467_v59  ;;  %v756_v36 = vand.u32 2147483647, %v2345_v21 }
  0x3d   : > { %v768_v60 = vsel %vm767_vm3, %v766_v43, 0  ;;  %v608_v7 = vadd.s32 1, %v2427_v48  ;;  %v472_v10 = vor.u32 %v471_v3, %v470_v1  ;;  %v495_v15 = vshll.u32 %v455_v51, 8 }
  0x3e   : > { %1956 = vmatpush3.bf16.msra.mxu0 %v1953_v46  ;;  %v477_v46 = vshrl.u32 %v2128_v45, %v2363_v37  ;;  %v2397_v2 = vand.u32 31, %v768_v60  ;;  %v2410_v20 = vshrl.u32 %v768_v60, 5  ;;  %v763_v51 = vand.u32 8388607, %v756_v36 }
  0x3f   : > { %1958 = vmatprep.subr.bf16.mxu0 %v1957_v49 }
  0x40   : > { %v478_v55 = vor.u32 %v477_v46, %v476_v42  ;;  %v2413_v26 = vsub.s32 32, %v2397_v2  ;;  %v782_v34 = vshll.u32 %v2126_v39, %v2397_v2  ;;  %v785_v46 = vshll.u32 %v2127_v41, %v2397_v2 }
  0x41   : > { %v2419_v42 = vmul.u32.u64.low %v598_v32, %v597_v38  ;;  %v2420_v43 = vmul.u32.u64.high %v598_v32, %v597_v38, %v2419_v42  ;;  %vm791_vm9 = vcmp.lt.s32.totalorder %v2410_v20, 4  ;;  %v773_v38 = vshll.u32 %v2130_v5, %v2397_v2 }
  0x42   : > { %1960 = vmatpush3.bf16.msra.mxu0 %v1957_v49  ;;  %v2375_v49 = vshrl.u32 %v459_v27, 5  ;;  %v586_v27 = vsel %vm582_vm6, %v566_v6, %v569_v13  ;;  %v776_v42 = vshll.u32 %v2131_v8, %v2397_v2  ;;  %v777_v44 = vshrl.u32 %v2132_v11, %v2413_v26 }
  0x43   : > { %1962 = vmatprep.subr.bf16.mxu0 %v1961_v52  ;;  %vm607_vm10 = vc.u32 %v2420_v43, %v2426_v47  ;;  %v779_v59 = vshll.u32 %v2132_v11, %v2397_v2  ;;  %vm788_vm15 = vcmp.lt.s32.totalorder %v2410_v20, 1  ;;  %vm790_vm0 = vcmp.lt.s32.totalorder %v2410_v20, 3 }
  0x44   : > { %vm482_vm4 = vcmp.lt.s32.totalorder %v2375_v49, 4  ;;  %vm479_vm11 = vcmp.lt.s32.totalorder %v2375_v49, 1  ;;  %vm480_vm12 = vcmp.lt.s32.totalorder %v2375_v49, 2  ;;  %vm481_vm13 = vcmp.lt.s32.totalorder %v2375_v49, 3 }
  0x45   : > { %v2390_v62 = vsel %vm482_vm4, %v2380_v54, 920167782  ;;  %v2394_v63 = vsel %vm482_vm4, %v478_v55, 1326507024  ;;  %v464_v55 = vshll.u32 %v2130_v5, %v2360_v33  ;;  %v786_v33 = vshrl.u32 %v2128_v45, %v2413_v26 }
  0x46   : > { %1964 = vmatpush3.bf16.msra.mxu0 %v1961_v52  ;;  %v2378_v52 = vsel %vm664_vm2, %v663_v35, 0  ;;  %v588_v35 = vsel %vm584_vm7, %v572_v22, %v587_v29  ;;  %v493_v14 = vsel %vm481_vm13, %v2380_v54, %v2394_v63  ;;  %v609_v16 = vsel %vm607_vm10, %v608_v7, %v2427_v48 }
  0x47   : > { %v2385_v61 = vand.u32 31, %v2378_v52  ;;  %v589_v40 = vsel %vm583_vm8, %v586_v27, %v588_v35  ;;  %v466_v6 = vor.u32 %v465_v56, %v464_v55  ;;  %v484_v17 = vsel %vm482_vm4, %v472_v10, 2102212464 }
  0x48   : > { %v605_v60 = vmul.u32 %v598_v32, %v589_v40  ;;  %v489_v13 = vsel %vm481_vm13, %v472_v10, %v2390_v62  ;;  %v485_v23 = vsel %vm481_vm13, %v469_v9, %v484_v17  ;;  %v491_v25 = vsel %vm479_vm11, %v469_v9, %v472_v10 }
  0x49   : > { %1776 = vmatmul.mubr.f32.vlgmr.msra.gmra.mrb[4].mxu0 %v2293_v53  ;;  %v483_v37 = vsel %vm479_vm11, %v463_v50, %v466_v6  ;;  %v487_v19 = vsel %vm479_vm11, %v466_v6, %v469_v9  ;;  %v494_v63 = vsel %vm480_vm12, %v491_v25, %v493_v14  ;;  %v783_v62 = vshrl.u32 %v2127_v41, %v2413_v26 }
  0x4a   : > { %v610_v22 = vadd.s32 %v609_v16, %v605_v60  ;;  %v490_v24 = vsel %vm480_vm12, %v487_v19, %v489_v13  ;;  %v486_v54 = vsel %vm480_vm12, %v483_v37, %v485_v23  ;;  %v787_v32 = vor.u32 %v786_v33, %v785_v46 }
  0x4b   : > { %v2471_v27 = vmul.u32.u64.low %v495_v15, %v490_v24  ;;  %v2472_v18 = vmul.u32.u64.high %v495_v15, %v490_v24, %v2471_v27  ;;  %v2477_v30 = vmul.u32.u64.low %v495_v15, %v494_v63  ;;  %v2478_v31 = vmul.u32.u64.high %v495_v15, %v494_v63, %v2477_v30 }
  0x4c   : > { %v611_v29 = vadd.s32 536870912, %v610_v22  ;;  %v502_v35 = vmul.u32 %v495_v15, %v486_v54  ;;  %v774_v40 = vshrl.u32 %v2131_v8, %v2413_v26  ;;  %v2492_v48 = vshrl.u32 %v2378_v52, 5 }
  0x4d   : > { %v2495_v46 = vsub.s32 32, %v2385_v61  ;;  %v505_v50 = vadd.s32 1, %v2472_v18  ;;  %v784_v55 = vor.u32 %v783_v62, %v782_v34  ;;  %vm504_vm14 = vc.u32 %v2478_v31, %v2471_v27 }
  0x4e   : > { %v2483_v49 = vshrl.u32 %v611_v29, 30  ;;  %v801_v52 = vsel %vm791_vm9, %v787_v32, 1326507024  ;;  %v775_v0 = vor.u32 %v774_v40, %v773_v38  ;;  %v778_v1 = vor.u32 %v777_v44, %v776_v42 }
  0x4f   : > { %v506_v60 = vsel %vm504_vm14, %v505_v50, %v2472_v18  ;;  %v764_v7 = vor.u32 8388608, %v763_v51  ;;  %v780_v34 = vshrl.u32 %v2126_v39, %v2413_v26  ;;  %v679_v9 = vshll.u32 %v2126_v39, %v2385_v61 }
  0x50   : > { %v613_v56 = vshll.u32 %v2483_v49, 30  ;;  %v507_v6 = vadd.s32 %v506_v60, %v502_v35  ;;  %v680_v10 = vshrl.u32 %v2127_v41, %v2495_v46  ;;  %v797_v2 = vsel %vm791_vm9, %v784_v55, 920167782 }
  0x51   : > { %v781_v14 = vor.u32 %v780_v34, %v779_v59  ;;  %v772_v15 = vshrl.u32 %v2130_v5, %v2413_v26  ;;  %vm789_vm1 = vcmp.lt.s32.totalorder %v2410_v20, 2  ;;  %v796_v16 = vsel %vm788_vm15, %v775_v0, %v778_v1 }
  0x52   : > { %v614_v3 = vsub.s32 %v610_v22, %v613_v56  ;;  %v508_v37 = vadd.s32 536870912, %v507_v6  ;;  %v802_v17 = vsel %vm790_vm0, %v784_v55, %v801_v52  ;;  %v682_v19 = vshll.u32 %v2127_v41, %v2385_v61 }
  0x53   : > { %v683_v13 = vshrl.u32 %v2128_v45, %v2495_v46  ;;  %v804_v23 = vshll.u32 %v764_v7, 8  ;;  %v793_v26 = vsel %vm791_vm9, %v781_v14, 2102212464  ;;  %v798_v25 = vsel %vm790_vm0, %v781_v14, %v797_v2 }
  0x54   : > { %v616_v33 = vsub.s32 0, %v614_v3  ;;  %v2529_v24 = vshrl.u32 %v508_v37, 30  ;;  %v800_v54 = vsel %vm788_vm15, %v778_v1, %v781_v14  ;;  %vm688_vm2 = vcmp.lt.s32.totalorder %v2492_v48, 4 }
  0x55   : > { %v799_v41 = vsel %vm789_vm1, %v796_v16, %v798_v25  ;;  %v803_v45 = vsel %vm789_vm1, %v800_v54, %v802_v17  ;;  %v2542_v18 = vor.u32 %v680_v10, %v679_v9  ;;  %v792_v29 = vsel %vm788_vm15, %v772_v15, %v775_v0 }
  0x56   : > { %v1492_v22 = vmin.u32 %v616_v33, %v614_v3  ;;  %v510_v62 = vshll.u32 %v2529_v24, 30  ;;  %v794_v30 = vsel %vm790_vm0, %v778_v1, %v793_v26  ;;  %v684_v32 = vor.u32 %v683_v13, %v682_v19 }
  0x57   : > { %v2549_v38 = vmul.u32.u64.low %v804_v23, %v803_v45  ;;  %v2550_v40 = vmul.u32.u64.high %v804_v23, %v803_v45, %v2549_v38  ;;  %v2554_v44 = vmul.u32.u64.low %v804_v23, %v799_v41  ;;  %v2555_v50 = vmul.u32.u64.high %v804_v23, %v799_v41, %v2554_v44 }
  0x58   : > { %v618_v63 = vclz %v1492_v22  ;;  %v2552_v42 = vsub.s32 %v507_v6, %v510_v62  ;;  %v606_v51 = vadd.s32 %v2426_v47, %v2420_v43  ;;  %v795_v55 = vsel %vm789_vm1, %v792_v29, %v794_v30 }
  0x59   : > { %v2565_v56 = vsel %vm688_vm2, %v2542_v18, 920167782  ;;  %v2570_v60 = vsel %vm688_vm2, %v684_v32, 1326507024  ;;  %vm552_vm4 = vcmp.lt.s32.totalorder %v2306_v58, 0  ;;  %v636_v20 = vsub.s32 4, %v2483_v49 }
  0x5a   : > { %v1493_v35 = vadd.s32 4294967294, %v618_v63  ;;  %v513_v52 = vsub.s32 0, %v2552_v42  ;;  %v811_v47 = vmul.u32 %v804_v23, %v795_v55  ;;  %vm813_vm5 = vc.u32 %v2550_v40, %v2554_v44 }
  0x5b   : > { %v814_v9 = vadd.s32 1, %v2555_v50  ;;  %vm2580_vm6 = vcmp.le.f32.partialorder %v550_v4, 0.7853982  ;;  %v653_v2 = vand.u32 2147483647, %v2335_v12  ;;  %v670_v33 = vshll.u32 %v2130_v5, %v2385_v61 }
  0x5c   : > { %vm1494_vm3 = vcmp.lt.s32.totalorder %v1493_v35, 0  ;;  %v1488_v43 = vmin.u32 %v513_v52, %v2552_v42  ;;  %v671_v16 = vshrl.u32 %v2131_v8, %v2495_v46  ;;  %v637_v4 = vsel %vm552_vm4, %v636_v20, %v2483_v49 }
  0x5d   : > { %v621_v59 = vsel %vm1494_vm3, 0, %v1493_v35  ;;  %v815_v15 = vsel %vm813_vm5, %v814_v9, %v2555_v50  ;;  %v503_v17 = vadd.s32 %v2471_v27, %v2478_v31  ;;  %v673_v26 = vshll.u32 %v2131_v8, %v2385_v61 }
  0x5e   : > { %v622_v0 = vsub.s32 32, %v621_v59  ;;  %v623_v1 = vshll.u32 %v614_v3, %v621_v59  ;;  %v626_v6 = vsub.s32 4294967266, %v621_v59  ;;  %v515_v3 = vclz %v1488_v43 }
  0x5f   : > { %v816_v13 = vadd.s32 %v815_v15, %v811_v47  ;;  %v674_v25 = vshrl.u32 %v2132_v11, %v2495_v46  ;;  %v676_v63 = vshll.u32 %v2132_v11, %v2385_v61  ;;  %v677_v49 = vshrl.u32 %v2126_v39, %v2495_v46 }
  0x60   : > { %v624_v7 = vshrl.u32 %v606_v51, %v622_v0  ;;  %v627_v34 = vadd.s32 127, %v626_v6  ;;  %v1489_v19 = vadd.s32 4294967294, %v515_v3  ;;  %v660_v31 = vand.u32 8388607, %v653_v2 }
  0x61   : > { %v817_v54 = vadd.s32 536870912, %v816_v13  ;;  %v672_v45 = vor.u32 %v671_v16, %v670_v33  ;;  %v675_v35 = vor.u32 %v674_v25, %v673_v26  ;;  %v678_v38 = vor.u32 %v677_v49, %v676_v63 }
  0x62   : > { %v625_v37 = vor.u32 %v624_v7, %v623_v1  ;;  %v628_v14 = vshll.u32 %v627_v34, 23  ;;  %vm1490_vm7 = vcmp.lt.s32.totalorder %v1489_v19, 0  ;;  %vm685_vm8 = vcmp.lt.s32.totalorder %v2492_v48, 1 }
  0x63   : > { %v518_v27 = vsel %vm1490_vm7, 0, %v1489_v19  ;;  %v2606_v30 = vshrl.u32 %v817_v54, 30  ;;  %vm687_vm9 = vcmp.lt.s32.totalorder %v2492_v48, 3  ;;  %v639_v51 = vsel %vm2580_vm6, 0, %v637_v4 }
  0x64   : > { %v629_v22 = vor.u32 4788187, %v628_v14  ;;  %v632_v23 = vcvt.s32.f32 %v625_v37  ;;  %v519_v62 = vsub.s32 32, %v518_v27  ;;  %v520_v8 = vshll.u32 %v2552_v42, %v518_v27 }
  0x65   : > { %v523_v29 = vsub.s32 4294967266, %v518_v27  ;;  %v819_v39 = vshll.u32 %v2606_v30, 30  ;;  %v661_v55 = vor.u32 8388608, %v660_v31  ;;  %v669_v42 = vshrl.u32 %v2130_v5, %v2495_v46 }
  0x66   : > { %v630_v41 = vand.u32 2147483647, %v629_v22  ;;  %v521_v61 = vshrl.u32 %v503_v17, %v519_v62  ;;  %v690_v1 = vsel %vm688_vm2, %v678_v38, 2102212464  ;;  %vm686_vm10 = vcmp.lt.s32.totalorder %v2492_v48, 2 }
  0x67   : > { %v524_v11 = vadd.s32 127, %v523_v29  ;;  %v820_v0 = vsub.s32 %v816_v13, %v819_v39  ;;  %v693_v20 = vsel %vm685_vm8, %v672_v45, %v675_v35  ;;  %v695_v43 = vsel %vm687_vm9, %v678_v38, %v2565_v56 }
  0x68   : > { %v633_v32 = vmul.f32 %v632_v23, %v630_v41  ;;  %v522_v59 = vor.u32 %v521_v61, %v520_v8  ;;  %v689_v34 = vsel %vm685_vm8, %v669_v42, %v672_v45  ;;  %v691_v9 = vsel %vm687_vm9, %v675_v35, %v690_v1 }
  0x69   : > { %v525_v52 = vshll.u32 %v524_v11, 23  ;;  %v822_v7 = vsub.s32 0, %v820_v0  ;;  %v697_v56 = vsel %vm685_vm8, %v675_v35, %v678_v38  ;;  %v643_v37 = vand.u32 3, %v639_v51 }
  0x6a   : > { %v634_v50 = vxor.u32 2147483648, %v633_v32  ;;  %v529_v47 = vcvt.s32.f32 %v522_v59  ;;  %v696_v10 = vsel %vm686_vm10, %v693_v20, %v695_v43  ;;  %v699_v14 = vsel %vm687_vm9, %v2542_v18, %v2570_v60 }
  0x6b   : > { %v526_v46 = vor.u32 4788187, %v525_v52  ;;  %v1500_v33 = vmin.u32 %v822_v7, %v820_v0  ;;  %v700_v4 = vsel %vm686_vm10, %v697_v56, %v699_v14  ;;  %v701_v17 = vshll.u32 %v661_v55, 8 }
  0x6c   : > { %v635_v6 = vsel %vm552_vm4, %v634_v50, %v633_v32  ;;  %vm2644_vm11 = vcmp.le.f32.partialorder %v447_v28, 0.7853982  ;;  %vm449_vm12 = vcmp.lt.s32.totalorder %v2303_v57, 0  ;;  %v533_v13 = vsub.s32 4, %v2529_v24 }
  0x6d   : > { %v638_v5 = vsel %vm2580_vm6, %v2306_v58, %v635_v6  ;;  %v527_v3 = vand.u32 2147483647, %v526_v46  ;;  %v824_v16 = vclz %v1500_v33  ;;  %v692_v22 = vsel %vm686_vm10, %v689_v34, %v691_v9 }
  0x6e   : > { %2076 = vcosq.f32 %v638_v5  ;;  %v2652_v23 = vmul.u32.u64.low %v701_v17, %v700_v4  ;;  %v2653_v26 = vmul.u32.u64.high %v701_v17, %v700_v4, %v2652_v23  ;;  %vm645_vm13 = vcmp.eq.s32.totalorder %v643_v37, 0 }
  0x6f   : > { %2078 = vsinq.f32 %v638_v5  ;;  %v530_v15 = vmul.f32 %v529_v47, %v527_v3  ;;  %v1501_v60 = vadd.s32 4294967294, %v824_v16  ;;  %v812_v63 = vadd.s32 %v2554_v44, %v2550_v40 }
  0x70   : > { %v2655_v25 = vmul.u32.u64.low %v701_v17, %v696_v10  ;;  %v2656_v54 = vmul.u32.u64.high %v701_v17, %v696_v10, %v2655_v25  ;;  %v534_v49 = vsel %vm449_vm12, %v533_v13, %v2529_v24  ;;  %v708_v27 = vmul.u32 %v701_v17, %v692_v22  ;;  %v2693_v13 = vld [vmem:[%s2866_s2 + $0x280] sm:$0xff] }
  0x71   : > { %v531_v18 = vxor.u32 2147483648, %v530_v15  ;;  %vm1502_vm14 = vcmp.lt.s32.totalorder %v1501_v60, 0  ;;  %vm648_vm15 = vcmp.eq.s32.totalorder %v643_v37, 2  ;;  %v536_v29 = vsel %vm2644_vm11, 0, %v534_v49 }
  0x72   : > { %v827_v41 = vsel %vm1502_vm14, 0, %v1501_v60  ;;  %vm710_vm0 = vc.u32 %v2653_v26, %v2655_v25  ;;  %v711_v40 = vadd.s32 1, %v2656_v54  ;;  %vm642_vm1 = vweird.f32 %v2306_v58 }
  0x73   : > { %v532_v28 = vsel %vm449_vm12, %v531_v18, %v530_v15  ;;  %v828_v31 = vsub.s32 32, %v827_v41  ;;  %v829_v45 = vshll.u32 %v820_v0, %v827_v41  ;;  %v832_v62 = vsub.s32 4294967266, %v827_v41 }
  0x74   : > { %v535_v48 = vsel %vm2644_vm11, %v2303_v57, %v532_v28  ;;  %vm644_vm2 = vcmp.lt.s32.totalorder %v643_v37, 2  ;;  %v712_v61 = vsel %vm710_vm0, %v711_v40, %v2656_v54  ;;  %v220_v55 = vlaneseq }
  0x75   : > { %2080 = vcosq.f32 %v535_v48  ;;  %v830_v32 = vshrl.u32 %v812_v63, %v828_v31  ;;  %v833_v35 = vadd.s32 127, %v832_v62  ;;  %v713_v51 = vadd.s32 %v712_v61, %v708_v27 }
  0x76   : > { %2082 = vsinq.f32 %v535_v48  ;;  %v540_v59 = vand.u32 3, %v536_v29  ;;  %v2675_v46 = vshrl.u32 %v220_v55, 7  ;;  %vm758_vm3 = vcmp.lt.s32.totalorder %v2345_v21, 0 }
  0x77   : > { %v831_v39 = vor.u32 %v830_v32, %v829_v45  ;;  %v834_v50 = vshll.u32 %v833_v35, 23  ;;  %v714_v6 = vadd.s32 536870912, %v713_v51  ;;  %vm2681_vm6 = vcmp.le.f32.partialorder %v756_v36, 0.7853982 }
  0x78   : > { %v2077_v8 = vpop.eup %2076  ;;  %vm545_vm4 = vcmp.eq.s32.totalorder %v540_v59, 2  ;;  %vm542_vm5 = vcmp.eq.s32.totalorder %v540_v59, 0  ;;  %v842_v37 = vsub.s32 4, %v2606_v30  ;;  %vm541_vm7 = vcmp.lt.s32.totalorder %v540_v59, 2 }
  0x79   : > { %v2079_v44 = vpop.eup %2078  ;;  %v649_v24 = vxor.u32 2147483648, %v2077_v8  ;;  %v835_v0 = vor.u32 4788187, %v834_v50  ;;  %v838_v1 = vcvt.s32.f32 %v831_v39  ;;  %v2673_v58 = vshrl.u32 %v714_v6, 30 }
  0x7a   : > { %v646_v38 = vxor.u32 2147483648, %v2079_v44  ;;  %vm539_vm8 = vweird.f32 %v2303_v57  ;;  %v222_v4 = vsub.s32 0, %v2675_v46  ;;  %v843_v18 = vsel %vm758_vm3, %v842_v37, %v2606_v30 }
  0x7b   : > { %v650_v11 = vsel %vm648_vm15, %v649_v24, %v2079_v44  ;;  %v836_v5 = vand.u32 2147483647, %v835_v0  ;;  %v716_v9 = vshll.u32 %v2673_v58, 30  ;;  %v845_v63 = vsel %vm2681_vm6, 0, %v843_v18 }
  0x7c   : > { %v647_v42 = vsel %vm645_vm13, %v2077_v8, %v646_v38  ;;  %v223_v28 = vrot.slane %v2693_v13, %v222_v4  ;;  %v849_v30 = vand.u32 3, %v845_v63  ;;  %v709_v62 = vadd.s32 %v2655_v25, %v2653_v26 }
  0x7d   : > { %v651_v52 = vsel %vm644_vm2, %v647_v42, %v650_v11  ;;  %v839_v34 = vmul.f32 %v838_v1, %v836_v5  ;;  %v717_v15 = vsub.s32 %v713_v51, %v716_v9  ;;  %vm848_vm13 = vweird.f32 %v2345_v21 }
  0x7e   : > { %v652_v20 = vsel %vm642_vm1, nan, %v651_v52  ;;  %vm850_vm10 = vcmp.lt.s32.totalorder %v849_v30, 2  ;;  %vm854_vm11 = vcmp.eq.s32.totalorder %v849_v30, 2  ;;  %vm851_vm12 = vcmp.eq.s32.totalorder %v849_v30, 0 }
  0x7f   : > { %v860_v43 = vadd.f32 1.0, %v652_v20  ;;  %v2081_v47 = vpop.eup %2080  ;;  %v840_v14 = vxor.u32 2147483648, %v839_v34  ;;  %v719_v36 = vsub.s32 0, %v717_v15  ;;  %vm655_vm14 = vcmp.lt.s32.totalorder %v2335_v12, 0 }
  0x80   : > { %v2083_v3 = vpop.eup %2082  ;;  %v546_v33 = vxor.u32 2147483648, %v2081_v47  ;;  %vm2724_vm15 = vcmp.le.f32.partialorder %v653_v2, 0.7853982 }
  0x81   : > { %v864_v7 = vmul.f32 0.5, %v860_v43  ;;  %v543_v10 = vxor.u32 2147483648, %v2083_v3  ;;  %v841_v19 = vsel %vm758_vm3, %v840_v14, %v839_v34  ;;  %v1496_v23 = vmin.u32 %v719_v36, %v717_v15 }
  0x82   : > { %v547_v16 = vsel %vm545_vm4, %v546_v33, %v2083_v3  ;;  %v844_v57 = vsel %vm2681_vm6, %v2345_v21, %v841_v19  ;;  %vm745_vm3 = vweird.f32 %v2335_v12  ;;  %vm995_vm4 = vcmask 130048  }
  0x83   : > { %874 = vperm.xlu1 %2075, %v864_v7   ;;  %v544_v17 = vsel %vm542_vm5, %v2081_v47, %v543_v10  ;;  %2084 = vcosq.f32 %v844_v57  ;;  %v721_v49 = vclz %v1496_v23  ;;  %vm1099_vm5 = vcmask 261120  }
  0x84   : > { %v548_v22 = vsel %vm541_vm7, %v544_v17, %v547_v16  ;;  %2086 = vsinq.f32 %v844_v57 }
  0x85   : > { %v549_v60 = vsel %vm539_vm8, nan, %v548_v22  ;;  %v1497_v41 = vadd.s32 4294967294, %v721_v49 }
  0x86   : > { %v859_v54 = vadd.f32 1.0, %v549_v60 }
  0x87   : > { %vm1498_vm9 = vcmp.lt.s32.totalorder %v1497_v41, 0 }
  0x88   : > { %v863_v48 = vmul.f32 0.5, %v859_v54  ;;  %v724_v40 = vsel %vm1498_vm9, 0, %v1497_v41 }
  0x89   : > { %v725_v24 = vsub.s32 32, %v724_v40  ;;  %v726_v29 = vshll.u32 %v717_v15, %v724_v40  ;;  %v729_v32 = vsub.s32 4294967266, %v724_v40  ;;  %v739_v15 = vsub.s32 4, %v2673_v58 }
  0x8a   : > { %869 = vperm.xlu0 %2074, %v863_v48  }
  0x8b   : > { %v727_v26 = vshrl.u32 %v709_v62, %v725_v24  ;;  %v730_v25 = vadd.s32 127, %v729_v32  ;;  %v740_v22 = vsel %vm655_vm14, %v739_v15, %v2673_v58  ;;  %v992_v32 = vpop.permute.xlu1 %991 }
  0x8c   : > { %v742_v57 = vsel %vm2724_vm15, 0, %v740_v22  ;;  %v1527_v22 = vld [vmem:[%s2866_s2 + $0x190] sm:$0xff] }
  0x8d   : > { %v2085_v61 = vpop.eup %2084  ;;  %v728_v52 = vor.u32 %v727_v26, %v726_v29  ;;  %v731_v0 = vshll.u32 %v730_v25, 23  ;;  %v746_v60 = vand.u32 3, %v742_v57 }
  0x8e   : > { %v2087_v50 = vpop.eup %2086  ;;  %v855_v55 = vxor.u32 2147483648, %v2085_v61 }
  0x8f   : > { %v852_v59 = vxor.u32 2147483648, %v2087_v50  ;;  %v732_v43 = vor.u32 4788187, %v731_v0  ;;  %v735_v5 = vcvt.s32.f32 %v728_v52  ;;  %vm751_vm0 = vcmp.eq.s32.totalorder %v746_v60, 2 }
  0x90   : > { %v856_v6 = vsel %vm854_vm11, %v855_v55, %v2087_v50  ;;  %vm748_vm1 = vcmp.eq.s32.totalorder %v746_v60, 0  ;;  %vm747_vm2 = vcmp.lt.s32.totalorder %v746_v60, 2 }
  0x91   : > { %v853_v20 = vsel %vm851_vm12, %v2085_v61, %v852_v59  ;;  %v733_v34 = vand.u32 2147483647, %v732_v43 }
  0x92   : > { %v857_v47 = vsel %vm850_vm10, %v853_v20, %v856_v6 }
  0x93   : > { %v858_v7 = vsel %vm848_vm13, nan, %v857_v47  ;;  %v736_v3 = vmul.f32 %v735_v5, %v733_v34 }
  0x94   : > { %v862_v9 = vadd.f32 1.0, %v858_v7 }
  0x95   : > { %v737_v37 = vxor.u32 2147483648, %v736_v3 }
  0x96   : > { %v866_v33 = vmul.f32 0.5, %v862_v9 }
  0x97   : > { %v738_v4 = vsel %vm655_vm14, %v737_v37, %v736_v3 }
  0x98   : > { %884 = vperm.xlu0 %2074, %v866_v33   ;;  %v741_v17 = vsel %vm2724_vm15, %v2335_v12, %v738_v4  ;;  %v1525_v4 = vld [vmem:[%s2866_s2 + $0x180] sm:$0xff] }
  0x9c   : > { %1097 = vrot.lane.b32.xlu0 %v2293_v53, %s2133_s27 }
  0xfc   : > { %v1701_v27 = vpop.f32.mrb[0].mxu0 }
  0xfd   : > { %v2704_v31 = vadd.f32 %v1701_v27, %v223_v28  ;;  %v290_v45 = vpop.f32.mrb[1].mxu0  ;;  %v988_v27 = vpop.permute.xlu0 %987 }
  0xfe   : > { %v2708_v8 = vadd.f32 %v290_v45, %v223_v28 }
  0xff   : > { %v1468_v44 = vmul.f32 -1.442695, %v2704_v31 }
 0x100   : > { %v1467_v35 = vmul.f32 -1.442695, %v2708_v8  ;;  %v1704_v38 = vpop.f32.mrb[2].mxu0 }
 0x101   : > { %2088 = vpow2.f32 %v1468_v44  ;;  %v2712_v11 = vadd.f32 %v1704_v38, %v223_v28  ;;  %v300_v39 = vpop.f32.mrb[3].mxu0  ;;  %v990_v61 = vpop.permute.xlu0 %989 }
 0x102   : > { %2090 = vpow2.f32 %v1467_v35  ;;  %v2714_v51 = vadd.f32 %v300_v39, %v223_v28  ;;  %v994_v39 = vpop.permute.xlu1 %993 }
 0x103   : > { %v1470_v42 = vmul.f32 -1.442695, %v2712_v11 }
 0x104   : > { %v1469_v1 = vmul.f32 -1.442695, %v2714_v51 }
 0x105   : > { %2092 = vpow2.f32 %v1470_v42 }
 0x106   : > { %2094 = vpow2.f32 %v1469_v1  ;;  %v875_v26 = vpop.permute.xlu1 %874 }
 0x109   : > { %v870_v52 = vpop.permute.xlu0 %869 }
 0x10b   : > { %v2089_v56 = vpop.eup %2088 }
 0x10c   : > { %v2091_v10 = vpop.eup %2090  ;;  %v322_v14 = vadd.f32 1.0, %v2089_v56 }
 0x10d   : > { %v321_v16 = vadd.f32 1.0, %v2091_v10 }
 0x10e   : > { %2096 = vrcp.f32 %v322_v14 }
 0x10f   : > { %v2093_v19 = vpop.eup %2092  ;;  %2098 = vrcp.f32 %v321_v16 }
 0x110   : > { %v2095_v2 = vpop.eup %2094  ;;  %v324_v36 = vadd.f32 1.0, %v2093_v19  ;;  %2100 = vcosq.f32 %v741_v17 }
 0x111   : > { %v323_v18 = vadd.f32 1.0, %v2095_v2  ;;  %2102 = vsinq.f32 %v741_v17  ;;  %v1526_v17 = vld [vmem:[%s2866_s2 + $0x188] sm:$0xff] }
 0x112   : > { %2104 = vrcp.f32 %v324_v36  ;;  %v1977_v36 = vpack.c.bf16 %v1526_v17, %v1525_v4 }
 0x113   : > { %2106 = vrcp.f32 %v323_v18  ;;  %v1528_v18 = vld [vmem:[%s2866_s2 + $0x198] sm:$0xff] }
 0x114   : > { %v1981_v60 = vpack.c.bf16 %v1528_v18, %v1527_v22 }
 0x117   : > { %v885_v34 = vpop.permute.xlu0 %884 }
 0x118   : > { %v2097_v23 = vpop.eup %2096 }
 0x119   : > { %v2099_v54 = vpop.eup %2098  ;;  %v334_v49 = vmul.f32 %v2097_v23, %v2704_v31  ;;  %v1529_v23 = vld [vmem:[%s2866_s2 + $0x1a0] sm:$0xff] }
 0x11a   : > { %v2101_v28 = vpop.eup %2100  ;;  %v333_v63 = vmul.f32 %v2099_v54, %v2708_v8  ;;  %v1530_v54 = vld [vmem:[%s2866_s2 + $0x1a8] sm:$0xff] }
 0x11b   : > { %v2103_v58 = vpop.eup %2102  ;;  %v752_v48 = vxor.u32 2147483648, %v2101_v28  ;;  %v1098_v57 = vpop.permute.xlu0 %1097 }
 0x11c   : > { %v2105_v53 = vpop.eup %2104  ;;  %1737 = vmatprep.mubr.f32.mxu1 %v333_v63  ;;  %v1777_v41 = vpop.f32.mrb[4].mxu0  ;;  %v749_v30 = vxor.u32 2147483648, %v2103_v58  ;;  %v1531_v63 = vld [vmem:[%s2866_s2 + $0x1b0] sm:$0xff] }
 0x11d   : > { %v2107_v45 = vpop.eup %2106  ;;  %1738 = vmatmul.mubr.f32.vlgmr.msra.gmra.mrb[0].mxu1 %v334_v49  ;;  %v974_v62 = vpop.f32.mrb[5].mxu0  ;;  %v753_v40 = vsel %vm751_vm0, %v752_v48, %v2103_v58  ;;  %v336_v31 = vmul.f32 %v2105_v53, %v2712_v11  ;;  %v2116_v11 = vld [vmem:[%s2256_s17] sm:$0xff]  ;;  %v1532_v58 = vld [vmem:[%s2866_s2 + $0x1b8] sm:$0xff]  ;;  %v1534_v53 = vld [vmem:[%s2866_s2 + $0x1c8] sm:$0xff] }
 0x11e   : > { %v335_v8 = vmul.f32 %v2107_v45, %v2714_v51  ;;  %v1965_v44 = vpack.c.bf16 %v1777_v41, %v974_v62  ;;  %v750_v24 = vsel %vm748_vm1, %v2101_v28, %v749_v30  ;;  %v356_v51 = vsub.s32 1, %v2675_v46  ;;  %v1533_v48 = vld [vmem:[%s2866_s2 + $0x1c0] sm:$0xff]  ;;  %v1536_v30 = vld [vmem:[%s2866_s2 + $0x1d8] sm:$0xff] }
 0x11f   : > { %v754_v29 = vsel %vm747_vm2, %v750_v24, %v753_v40  ;;  %v1985_v28 = vpack.c.bf16 %v1530_v54, %v1529_v23  ;;  %v1989_v49 = vpack.c.bf16 %v1532_v58, %v1531_v63  ;;  %v1993_v41 = vpack.c.bf16 %v1534_v53, %v1533_v48  ;;  %v1537_v62 = vld [vmem:[%s2866_s2 + $0x1e0] sm:$0xff]  ;;  %v1538_v40 = vld [vmem:[%s2866_s2 + $0x1e8] sm:$0xff]  ;;  %v1540_v24 = vld [vmem:[%s2866_s2 + $0x1f8] sm:$0xff] }
 0x120   : > { %1740 = vmatprep.mubr.f32.mxu1 %v335_v8  ;;  %1966 = vmatprep.subr.bf16.mxu1 %v1965_v44  ;;  %v755_v35 = vsel %vm745_vm3, nan, %v754_v29  ;;  %v357_v55 = vrot.slane %v2693_v13, %v356_v51  ;;  %v2001_v8 = vpack.c.bf16 %v1538_v40, %v1537_v62  ;;  %v1549_v51 = vld [vmem:[%s2866_s2 + $0x230] sm:$0xff] }
 0x121   : > { %1741 = vmatmul.mubr.f32.gmra.mrb[2].mxu1 %v336_v31  ;;  %v861_v38 = vadd.f32 1.0, %v755_v35  ;;  %v1543_v35 = vld [vmem:[%s2866_s2 + $0x200] sm:$0xff] }
 0x122   : > { %1968 = vmatpush3.bf16.msra.mxu1 %v1965_v44  ;;  %1782 = vmatprep.mubr.msk.f32.mxu1 %vm995_vm4, %v988_v27  ;;  %v1535_v27 = vld [vmem:[%s2866_s2 + $0x1d0] sm:$0xff] }
 0x123   : > { %v865_v12 = vmul.f32 0.5, %v861_v38  ;;  %v1997_v45 = vpack.c.bf16 %v1536_v30, %v1535_v27  ;;  %v1539_v44 = vld [vmem:[%s2866_s2 + $0x1f0] sm:$0xff]  ;;  %v1544_v38 = vld [vmem:[%s2866_s2 + $0x208] sm:$0xff] }
 0x124   : > { %v2005_v31 = vpack.c.bf16 %v1540_v24, %v1539_v44 }
 0x125   : > { %1783 = vmatmul.mubr.msk.f32.vlgmr.msra.gmra.mrb[4].mxu1 %vm995_vm4, %v990_v61  ;;  %879 = vperm.xlu1 %2075, %v865_v12   ;;  %v2009_v61 = vpack.c.bf16 %v1544_v38, %v1543_v35  ;;  %v1545_v12 = vld [vmem:[%s2866_s2 + $0x210] sm:$0xff] }
 0x126   : > { %1785 = vmatprep.mubr.msk.f32.mxu1 %vm995_vm4, %v992_v32 }
 0x127   : > { %2010 = vmatprep.subr.bf16.mxu0 %v2009_v61 }
 0x128   : > { %2012 = vmatpush3.bf16.msra.mxu0 %v2009_v61 }
 0x129   : > { %1786 = vmatmul.mubr.msk.f32.gmra.mrb[6].mxu1 %vm995_vm4, %v994_v39  ;;  %1095 = vrot.lane.b32.xlu1 %v2116_v11, %s2133_s27  ;;  %v1546_v39 = vld [vmem:[%s2866_s2 + $0x218] sm:$0xff] }
 0x12a   : > { %v2013_v11 = vpack.c.bf16 %v1546_v39, %v1545_v12 }
 0x12c   : > { %2014 = vmatprep.subr.bf16.mxu0 %v2013_v11 }
 0x12d   : > { %2016 = vmatpush3.bf16.msra.mxu0 %v2013_v11 }
 0x1a4   : > { %v880_v25 = vpop.permute.xlu1 %879 }
 0x1a8   : > { %v1096_v50 = vpop.permute.xlu1 %1095 }
 0x1a9   : > { %1796 = vmatprep.mubr.msk.f32.mxu1 %vm1099_vm5, %v1096_v50 }
 0x1f0   : > { %v1739_v42 = vpop.f32.mrb[0].mxu1 }
 0x1f1   : > { %v424_v59 = vpop.f32.mrb[1].mxu1  ;;  %v430_v0 = vadd.f32 %v1739_v42, %v357_v55 }
 0x1f2   : > { %v425_v1 = vadd.f32 %v424_v59, %v357_v55  ;;  %v1551_v59 = vld [vmem:[%s2866_s2 + $0x240] sm:$0xff] }
 0x1f3   : > { %v888_v43 = vmul.f32 %v875_v26, %v430_v0  ;;  %v1547_v26 = vld [vmem:[%s2866_s2 + $0x220] sm:$0xff] }
 0x1f4   : > { %v1742_v6 = vpop.f32.mrb[2].mxu1  ;;  %v887_v47 = vmul.f32 %v870_v52, %v425_v1  ;;  %v1552_v52 = vld [vmem:[%s2866_s2 + $0x248] sm:$0xff]  ;;  %v1553_v1 = vld [vmem:[%s2866_s2 + $0x250] sm:$0xff] }
 0x1f5   : > { %v434_v20 = vpop.f32.mrb[3].mxu1  ;;  %v440_v5 = vadd.f32 %v1742_v6, %v357_v55  ;;  %v2025_v0 = vpack.c.bf16 %v1552_v52, %v1551_v59  ;;  %v1554_v6 = vld [vmem:[%s2866_s2 + $0x258] sm:$0xff] }
 0x1f6   : > { %v435_v7 = vadd.f32 %v434_v20, %v357_v55  ;;  %v1550_v55 = vld [vmem:[%s2866_s2 + $0x238] sm:$0xff]  ;;  %v2029_v20 = vpack.c.bf16 %v1554_v6, %v1553_v1 }
 0x1f7   : > { %v890_v21 = vmul.f32 %v885_v34, %v440_v5  ;;  %v2021_v42 = vpack.c.bf16 %v1550_v55, %v1549_v51  ;;  %v1556_v5 = vld [vmem:[%s2866_s2 + $0x268] sm:$0xff]  ;;  %v1558_v34 = vld [vmem:[%s2866_s2 + $0x278] sm:$0xff] }
 0x1f8   : > { %v1784_v9 = vpop.f32.mrb[4].mxu1  ;;  %v889_v37 = vmul.f32 %v880_v25, %v435_v7  ;;  %v1548_v25 = vld [vmem:[%s2866_s2 + $0x228] sm:$0xff]  ;;  %v1557_v7 = vld [vmem:[%s2866_s2 + $0x270] sm:$0xff] }
 0x1f9   : > { %v1090_v3 = vmul.f32 %v1784_v9, %v888_v43  ;;  %v1070_v33 = vpop.f32.mrb[5].mxu1  ;;  %v2017_v50 = vpack.c.bf16 %v1548_v25, %v1547_v26  ;;  %v1555_v43 = vld [vmem:[%s2866_s2 + $0x260] sm:$0xff]  ;;  %v2037_v9 = vpack.c.bf16 %v1558_v34, %v1557_v7 }
 0x1fa   : > { %v1089_v56 = vmul.f32 %v1070_v33, %v887_v47  ;;  %v2033_v47 = vpack.c.bf16 %v1556_v5, %v1555_v43 }
 0x1fb   : > { %2018 = vmatprep.subr.bf16.mxu0 %v2017_v50 }
 0x1fc   : > { %v1969_v10 = vpack.c.bf16 %v1090_v3, %v1089_v56  ;;  %v1787_v14 = vpop.f32.mrb[6].mxu1  ;;  %2020 = vmatpush3.bf16.msra.mxu0 %v2017_v50  ;;  %v1198_v3 = vsub.s32 2, %v2675_v46 }
 0x1fd   : > { %v1092_v15 = vmul.f32 %v1787_v14, %v890_v21  ;;  %v1080_v16 = vpop.f32.mrb[7].mxu1  ;;  %2022 = vmatprep.subr.bf16.mxu0 %v2021_v42 }
 0x1fe   : > { %v1091_v19 = vmul.f32 %v1080_v16, %v889_v37  ;;  %1970 = vmatprep.subr.bf16.mxu1 %v1969_v10  ;;  %v1199_v33 = vrot.slane %v2693_v13, %v1198_v3 }
 0x1ff   : > { %1972 = vmatpush3.bf16.msra.mxu1 %v1969_v10 }
 0x200   : > { %v1973_v2 = vpack.c.bf16 %v1092_v15, %v1091_v19  ;;  %2024 = vmatpush3.bf16.msra.mxu0 %v2021_v42 }
 0x201   : > { %2026 = vmatprep.subr.bf16.mxu0 %v2025_v0 }
 0x202   : > { %1974 = vmatprep.subr.bf16.mxu1 %v1973_v2 }
 0x203   : > { %1976 = vmatpush3.bf16.msra.mxu1 %v1973_v2 }
 0x204   : > { %1978 = vmatprep.subr.bf16.mxu1 %v1977_v36  ;;  %2028 = vmatpush3.bf16.msra.mxu0 %v2025_v0 }
 0x205   : > { %2030 = vmatprep.subr.bf16.mxu0 %v2029_v20 }
 0x206   : > { %1797 = vmatmul.mubr.msk.f32.vlgmr.msra.gmra.mrb[8].mxu1 %vm1099_vm5, %v1098_v57  ;;  %v1308_v57 = vsub.s32 3, %v2675_v46 }
 0x207   : > { %1980 = vmatpush3.bf16.msra.mxu1 %v1977_v36 }
 0x208   : > { %1982 = vmatprep.subr.bf16.mxu1 %v1981_v60  ;;  %2032 = vmatpush3.bf16.msra.mxu0 %v2029_v20 }
 0x209   : > { %2034 = vmatprep.subr.bf16.mxu0 %v2033_v47 }
 0x20b   : > { %1984 = vmatpush3.bf16.msra.mxu1 %v1981_v60  ;;  %v1309_v60 = vrot.slane %v2693_v13, %v1308_v57 }
 0x20c   : > { %1986 = vmatprep.subr.bf16.mxu1 %v1985_v28  ;;  %2036 = vmatpush3.bf16.msra.mxu0 %v2033_v47 }
 0x20d   : > { %2038 = vmatprep.subr.bf16.mxu0 %v2037_v9 }
 0x20f   : > { %1988 = vmatpush3.bf16.msra.mxu1 %v1985_v28 }
 0x210   : > { %1990 = vmatprep.subr.bf16.mxu1 %v1989_v49  ;;  %2040 = vmatpush3.bf16.msra.mxu0 %v2037_v9 }
 0x213   : > { %1992 = vmatpush3.bf16.msra.mxu1 %v1989_v49 }
 0x214   : > { %1994 = vmatprep.subr.bf16.mxu1 %v1993_v41 }
 0x217   : > { %1996 = vmatpush3.bf16.msra.mxu1 %v1993_v41 }
 0x218   : > { %1998 = vmatprep.subr.bf16.mxu1 %v1997_v45 }
 0x21b   : > { %2000 = vmatpush3.bf16.msra.mxu1 %v1997_v45 }
 0x21c   : > { %2002 = vmatprep.subr.bf16.mxu1 %v2001_v8 }
 0x21f   : > { %2004 = vmatpush3.bf16.msra.mxu1 %v2001_v8 }
 0x220   : > { %2006 = vmatprep.subr.bf16.mxu1 %v2005_v31 }
 0x223   : > { %2008 = vmatpush3.bf16.msra.mxu1 %v2005_v31 }
 0x2d9   : > { %v1798_v29 = vpop.f32.mrb[8].mxu1 }
 0x2da   : > { %v1170_v32 = vpop.f32.mrb[9].mxu1 }
 0x2db   : > { %1831 = vmatprep.mubr.f32.mxu1 %v1170_v32 }
 0x2dc   : > { %1832 = vmatmul.mubr.f32.vlgmr.msra.gmra.mrb[10].mxu1 %v1798_v29 }
 0x3af   : > { %v1833_v56 = vpop.f32.mrb[10].mxu1 }
 0x3b0   : > { %v1272_v21 = vadd.f32 %v1833_v56, %v1199_v33  ;;  %v1266_v37 = vpop.f32.mrb[11].mxu1 }
 0x3b1   : > { %v1267_v10 = vadd.f32 %v1266_v37, %v1199_v33 }
 0x3b2   : > { %v1542_v14 = vmul.f32 -1.442695, %v1272_v21 }
 0x3b3   : > { %v1541_v15 = vmul.f32 -1.442695, %v1267_v10 }
 0x3b4   : > { %2108 = vpow2.f32 %v1542_v14 }
 0x3b5   : > { %2110 = vpow2.f32 %v1541_v15 }
 0x3be   : > { %v2109_v16 = vpop.eup %2108 }
 0x3bf   : > { %v2111_v4 = vpop.eup %2110  ;;  %v1282_v17 = vadd.f32 1.0, %v2109_v16 }
 0x3c0   : > { %v1281_v19 = vadd.f32 1.0, %v2111_v4 }
 0x3c1   : > { %2112 = vrcp.f32 %v1282_v17 }
 0x3c2   : > { %2114 = vrcp.f32 %v1281_v19 }
 0x3cb   : > { %v2113_v2 = vpop.eup %2112 }
 0x3cc   : > { %v2115_v36 = vpop.eup %2114  ;;  %v1288_v18 = vmul.f32 %v2113_v2, %v1272_v21 }
 0x3cd   : > { %v1287_v22 = vmul.f32 %v2115_v36, %v1267_v10 }
 0x3cf   : > { %1866 = vmatprep.mubr.f32.mxu0 %v1287_v22 }
 0x3d0   : > { %1867 = vmatmul.mubr.f32.vlgmr.msra.gmra.mrb[6].mxu0 %v1288_v18 }
 0x4a3   : > { %v1868_v23 = vpop.f32.mrb[6].mxu0 }
 0x4a4   : > { %v1376_v54 = vpop.f32.mrb[7].mxu0  ;;  %v1382_v63 = vadd.f32 %v1868_v23, %v1309_v60 }
 0x4a5   : > { %v1377_v28 = vadd.f32 %v1376_v54, %v1309_v60 }
 0x4a6   : > { %1386 = vst [vmem:[%s194_s21 + $0x8] sm:$0xff] %v1382_v63 }
 0x4a7   : > { %1385 = vst [vmem:[%s194_s21] sm:$0xff] %v1377_v28 }
 0x4a8 PF: > { %s13_s12 = sadd.s32 1, %s2123_s12  }
 0x4a9   : > { %p10_p5 = scmp.ge.s32.totalorder %s13_s12, 4  }
 0x4ab   :  { %12 = sbr.rel (!%p10_p5) target bundleno = 1 (0x1), region = 70 }

</bundles_post_ra>
